<compile_context>
chip_gen: v5e
topology: v5e:2x2
jax: 0.10.0
libtpu: 0.0.40
codegen_flags: <defaults>
</compile_context>

<pallas_src>
import functools

import jax
import jax.numpy as jnp
from jax.experimental import pallas as pl
from jax.experimental.pallas import tpu as pltpu


# ----------------------------- Pallas kernel ------------------------------- #

def _fused_perceptual_kernel(pi_ref, pt_ref, w_ref, b_ref, o_ref, acc_ref, *,
                             inv_p):
    """One (image n, spatial tile j) step of the fused perceptual similarity.

    pi_ref / pt_ref : (1, tp, K)  bf16 im2col patches (input / target)
    w_ref           : (K, Cf)     bf16 conv weight (zero-padded rows for K pad)
    b_ref           : (1, Cf)     f32  conv bias
    o_ref           : (1, 8, 128) f32  lane-dense per-image result (broadcast)
    acc_ref         : (tp, Cf)    f32  running sum of (ni - nt)^2 over tiles
    """
    j = pl.program_id(1)

    @pl.when(j == 0)
    def _():
        acc_ref[...] = jnp.zeros_like(acc_ref)

    w = w_ref[...]
    b = b_ref[...]
    pi = pi_ref[0]                      # (tp, K)
    pt = pt_ref[0]

    # Conv-as-matmul stem (bf16 operands, f32 accumulate) + bias + ReLU.
    fi = jnp.maximum(jnp.dot(pi, w, preferred_element_type=jnp.float32) + b, 0.0)
    ft = jnp.maximum(jnp.dot(pt, w, preferred_element_type=jnp.float32) + b, 0.0)

    # normalize_tensor: x / (sqrt(sum(x^2, channels)) + eps)  (eps outside sqrt,
    # matching PyTorch). Approx reciprocal runs on the EUP slot (near-free).
    eps = 1e-10
    inv_i = pl.reciprocal(
        jnp.sqrt(jnp.sum(fi * fi, axis=-1, keepdims=True)) + eps, approx=True)
    inv_t = pl.reciprocal(
        jnp.sqrt(jnp.sum(ft * ft, axis=-1, keepdims=True)) + eps, approx=True)

    d = fi * inv_i - ft * inv_t
    acc_ref[...] += d * d               # defer all reductions to finalize

    @pl.when(j == pl.num_programs(1) - 1)
    def _():
        chan = jnp.sum(acc_ref[...], axis=0, keepdims=True)      # (1, Cf)
        tot = jnp.sum(chan, axis=1, keepdims=True) * inv_p        # (1, 1)
        o_ref[...] = jnp.broadcast_to(tot.reshape(1, 1, 1), o_ref.shape)


def fused_perceptual(patches_in, patches_tgt, weight, bias, *, p_actual, tp):
    """patches_*: (N, P_pad, K_pad) bf16; weight: (K_pad, Cf) bf16; bias: (1, Cf) f32."""
    N, P_pad, K_pad = patches_in.shape
    Cf = weight.shape[1]
    num_tiles = P_pad // tp

    kernel = functools.partial(_fused_perceptual_kernel, inv_p=1.0 / float(p_actual))

    out = pl.pallas_call(
        kernel,
        out_shape=jax.ShapeDtypeStruct((N, 8, 128), jnp.float32),
        grid_spec=pltpu.PrefetchScalarGridSpec(
            num_scalar_prefetch=0,
            grid=(N, num_tiles),
            in_specs=[
                pl.BlockSpec((1, tp, K_pad), lambda n, j: (n, j, 0)),
                pl.BlockSpec((1, tp, K_pad), lambda n, j: (n, j, 0)),
                pl.BlockSpec((K_pad, Cf), lambda n, j: (0, 0)),
                pl.BlockSpec((1, Cf), lambda n, j: (0, 0)),
            ],
            out_specs=pl.BlockSpec((1, 8, 128), lambda n, j: (n, 0, 0)),
            scratch_shapes=[pltpu.VMEM((tp, Cf), jnp.float32)],
        ),
        compiler_params=pltpu.CompilerParams(
            dimension_semantics=("parallel", "arbitrary"),
            vmem_limit_bytes=32 * 1024 * 1024,
        ),
    )(patches_in, patches_tgt, weight, bias)

    return out[:, 0, 0]                 # (N,)


# --------------------------------- Glue ------------------------------------ #

def _round_up(v, m):
    return (v + m - 1) // m * m


def _preprocess(x):
    """Repeat 1->3 channels, RGB->BGR reorder, subtract per-channel mean."""
    if x.shape[1] == 1:
        x = jnp.tile(x, (1, 3, 1, 1))
    x = x[:, ::-1, :, :]                               # channel order [2, 1, 0]
    mean = jnp.array([0.406, 0.456, 0.485], dtype=x.dtype).reshape(1, 3, 1, 1)
    return x - mean


def _im2col_nchw(x, kh=3, kw=3, stride=2, pad=1):
    """NCHW -> channels-last patches (N, Ho*Wo, kh*kw*C)."""
    x = jnp.transpose(x, (0, 2, 3, 1))                 # NHWC
    N, H, W, C = x.shape
    xp = jnp.pad(x, ((0, 0), (pad, pad), (pad, pad), (0, 0)))
    Ho = (H + 2 * pad - kh) // stride + 1
    Wo = (W + 2 * pad - kw) // stride + 1
    cols = []
    for i in range(kh):
        for j in range(kw):
            cols.append(xp[:, i:i + stride * Ho:stride, j:j + stride * Wo:stride, :])
    patches = jnp.concatenate(cols, axis=-1)           # (N, Ho, Wo, kh*kw*C)
    return patches.reshape(N, Ho * Wo, kh * kw * C), (N, Ho, Wo)


def _pad_patches(p, p_pad, k_pad):
    N, P, K = p.shape
    return jnp.pad(p, ((0, 0), (0, p_pad - P), (0, k_pad - K)))


def init_feature_extractor_params(key, cin=3, cf=32, kh=3, kw=3):
    """Deterministic synthetic weights for the stand-in feature extractor."""
    k1, k2 = jax.random.split(key)
    fan_in = kh * kw * cin
    w = jax.random.normal(k1, (fan_in, cf), jnp.float32) * (1.0 / fan_in) ** 0.5
    b = jax.random.normal(k2, (1, cf), jnp.float32) * 0.01
    return w, b


def radimagenet_perceptual(inp, tgt, weight, bias, *, tp_max=512):
    """Full forward pass of RadImageNetPerceptualSimilarity (synthetic backbone)."""
    inp = _preprocess(inp)
    tgt = _preprocess(tgt)

    pi, (N, Ho, Wo) = _im2col_nchw(inp)
    pt, _ = _im2col_nchw(tgt)

    P = Ho * Wo
    K = pi.shape[-1]
    Cf = weight.shape[1]

    # Align K to 32 lanes, pick a large spatial tile, and pad P with zero rows.
    # Zero-padded rows produce identical (ReLU(bias)) features for input and
    # target, so they contribute exactly 0 to the squared-diff sum.
    k_pad = max(32, _round_up(K, 8))
    tp = min(tp_max, _round_up(P, 16))
    p_pad = _round_up(P, tp)

    pi = _pad_patches(pi, p_pad, k_pad).astype(jnp.bfloat16)
    pt = _pad_patches(pt, p_pad, k_pad).astype(jnp.bfloat16)
    w_pad = jnp.zeros((k_pad, Cf), jnp.float32).at[:K].set(weight).astype(jnp.bfloat16)
    b = bias.reshape(1, Cf).astype(jnp.float32)

    res = fused_perceptual(pi, pt, w_pad, b, p_actual=P, tp=tp)   # (N,)
    return res.reshape(N, 1, 1, 1)      # matches PyTorch (N, 1, 1, 1) output


# --------------------------------- Main ------------------------------------ #

if __name__ == "__main__":
    key = jax.random.PRNGKey(0)
    k_in, k_tgt = jax.random.split(key)

    N, C, H, W = 2, 3, 16, 16
    # inputs expected normalized to [0, 1]
    x = jax.random.uniform(k_in, (N, C, H, W), jnp.float32)
    t = jax.random.uniform(k_tgt, (N, C, H, W), jnp.float32)

    w, b = init_feature_extractor_params(jax.random.PRNGKey(42))

    out = radimagenet_perceptual(x, t, w, b)
    out = jax.block_until_ready(out)
    assert out.shape == (N, 1, 1, 1), out.shape
    assert jnp.all(jnp.isfinite(out))
    print("KERNEL_OK")
</pallas_src>

<mosaic_0001>
module attributes {stable_mosaic.version = 11 : i64} {
  func.func @_fused_perceptual_kernel(%arg0: i32, %arg1: i32, %arg2: memref<1x64x32xbf16, #tpu.memory_space<vmem>>, %arg3: memref<1x64x32xbf16, #tpu.memory_space<vmem>>, %arg4: memref<32x32xbf16, #tpu.memory_space<vmem>>, %arg5: memref<1x32xf32, #tpu.memory_space<vmem>>, %arg6: memref<1x8x128xf32, #tpu.memory_space<vmem>>, %arg7: memref<64x32xf32, #tpu.memory_space<vmem>>) attributes {dimension_semantics = [#tpu.dimension_semantics<parallel>, #tpu.dimension_semantics<arbitrary>], iteration_bounds = array<i64: 2, 1>, scalar_prefetch = 0 : i64, scratch_operands = 1 : i64, tpu.core_type = #tpu.core_type<tc>, window_params = [{transform_indices = @transform_0, window_bounds = array<i64: 1, 64, 32>}, {transform_indices = @transform_1, window_bounds = array<i64: 1, 64, 32>}, {pipeline_mode = #tpu.pipeline_mode<synchronous>, transform_indices = @transform_2, window_bounds = array<i64: 32, 32>}, {pipeline_mode = #tpu.pipeline_mode<synchronous>, transform_indices = @transform_3, window_bounds = array<i64: 1, 32>}, {transform_indices = @transform_4, window_bounds = array<i64: 1, 8, 128>}]} {
    %c0_i32 = arith.constant 0 : i32
    %0 = arith.cmpi eq, %arg1, %c0_i32 : i32
    %1 = arith.extui %0 : i1 to i32
    %c0_i32_0 = arith.constant 0 : i32
    %2 = arith.cmpi ne, %1, %c0_i32_0 : i32
    scf.if %2 {
      %cst_23 = arith.constant 0.000000e+00 : f32
      %45 = vector.broadcast %cst_23 : f32 to vector<64x32xf32>
      %c0_24 = arith.constant 0 : index
      %c0_25 = arith.constant 0 : index
      %46 = vector.load %arg7[%c0_24, %c0_25] : memref<64x32xf32, #tpu.memory_space<vmem>>, vector<64x32xf32>
      tpu.vector_store %arg7[%c0_24, %c0_25], %45 {strides = array<i32>} : memref<64x32xf32, #tpu.memory_space<vmem>>, vector<64x32xf32>,
    } else {
    }
    %c0 = arith.constant 0 : index
    %c0_1 = arith.constant 0 : index
    %3 = vector.load %arg4[%c0, %c0_1] : memref<32x32xbf16, #tpu.memory_space<vmem>>, vector<32x32xbf16>
    %c0_2 = arith.constant 0 : index
    %c0_3 = arith.constant 0 : index
    %4 = vector.load %arg5[%c0_2, %c0_3] : memref<1x32xf32, #tpu.memory_space<vmem>>, vector<1x32xf32>
    %c0_4 = arith.constant 0 : index
    %c0_5 = arith.constant 0 : index
    %c0_6 = arith.constant 0 : index
    %5 = vector.load %arg2[%c0_4, %c0_5, %c0_6] : memref<1x64x32xbf16, #tpu.memory_space<vmem>>, vector<1x64x32xbf16>
    %6 = vector.shape_cast %5 : vector<1x64x32xbf16> to vector<64x32xbf16>
    %c0_7 = arith.constant 0 : index
    %c0_8 = arith.constant 0 : index
    %c0_9 = arith.constant 0 : index
    %7 = vector.load %arg3[%c0_7, %c0_8, %c0_9] : memref<1x64x32xbf16, #tpu.memory_space<vmem>>, vector<1x64x32xbf16>
    %8 = vector.shape_cast %7 : vector<1x64x32xbf16> to vector<64x32xbf16>
    %cst = arith.constant dense<0.000000e+00> : vector<64x32xf32>
    %9 = tpu.matmul %6, %3, %cst {dimension_numbers = #tpu.dot_dimension_numbers<[1], [0], [0], [1], [0, 0, 1, 1], [], []>} : vector<64x32xbf16>, vector<32x32xbf16>, vector<64x32xf32> -> vector<64x32xf32>
    %10 = vector.broadcast %4 : vector<1x32xf32> to vector<64x32xf32>
    %11 = arith.addf %9, %10 : vector<64x32xf32>
    %cst_10 = arith.constant 0.000000e+00 : f32
    %12 = vector.broadcast %cst_10 : f32 to vector<64x32xf32>
    %13 = arith.maximumf %11, %12 : vector<64x32xf32>
    %cst_11 = arith.constant dense<0.000000e+00> : vector<64x32xf32>
    %14 = tpu.matmul %8, %3, %cst_11 {dimension_numbers = #tpu.dot_dimension_numbers<[1], [0], [0], [1], [0, 0, 1, 1], [], []>} : vector<64x32xbf16>, vector<32x32xbf16>, vector<64x32xf32> -> vector<64x32xf32>
    %15 = vector.broadcast %4 : vector<1x32xf32> to vector<64x32xf32>
    %16 = arith.addf %14, %15 : vector<64x32xf32>
    %cst_12 = arith.constant 0.000000e+00 : f32
    %17 = vector.broadcast %cst_12 : f32 to vector<64x32xf32>
    %18 = arith.maximumf %16, %17 : vector<64x32xf32>
    %19 = arith.mulf %13, %13 : vector<64x32xf32>
    %cst_13 = arith.constant dense<0.000000e+00> : vector<64xf32>
    %20 = vector.multi_reduction <add>, %19, %cst_13 [1] : vector<64x32xf32> to vector<64xf32>
    %21 = vector.shape_cast %20 : vector<64xf32> to vector<64x1xf32>
    %22 = math.sqrt %21 : vector<64x1xf32>
    %cst_14 = arith.constant 1.000000e-10 : f32
    %23 = vector.broadcast %cst_14 : f32 to vector<64x1xf32>
    %24 = arith.addf %22, %23 : vector<64x1xf32>
    %25 = tpu.reciprocal %24 {approx = true} : vector<64x1xf32> -> vector<64x1xf32>
    %26 = arith.mulf %18, %18 : vector<64x32xf32>
    %cst_15 = arith.constant dense<0.000000e+00> : vector<64xf32>
    %27 = vector.multi_reduction <add>, %26, %cst_15 [1] : vector<64x32xf32> to vector<64xf32>
    %28 = vector.shape_cast %27 : vector<64xf32> to vector<64x1xf32>
    %29 = math.sqrt %28 : vector<64x1xf32>
    %cst_16 = arith.constant 1.000000e-10 : f32
    %30 = vector.broadcast %cst_16 : f32 to vector<64x1xf32>
    %31 = arith.addf %29, %30 : vector<64x1xf32>
    %32 = tpu.reciprocal %31 {approx = true} : vector<64x1xf32> -> vector<64x1xf32>
    %33 = vector.broadcast %25 : vector<64x1xf32> to vector<64x32xf32>
    %34 = arith.mulf %13, %33 : vector<64x32xf32>
    %35 = vector.broadcast %32 : vector<64x1xf32> to vector<64x32xf32>
    %36 = arith.mulf %18, %35 : vector<64x32xf32>
    %37 = arith.subf %34, %36 : vector<64x32xf32>
    %c0_17 = arith.constant 0 : index
    %c0_18 = arith.constant 0 : index
    %38 = vector.load %arg7[%c0_17, %c0_18] : memref<64x32xf32, #tpu.memory_space<vmem>>, vector<64x32xf32>
    %39 = arith.mulf %37, %37 : vector<64x32xf32>
    %40 = arith.addf %38, %39 : vector<64x32xf32>
    %c0_19 = arith.constant 0 : index
    %c0_20 = arith.constant 0 : index
    %41 = vector.load %arg7[%c0_19, %c0_20] : memref<64x32xf32, #tpu.memory_space<vmem>>, vector<64x32xf32>
    tpu.vector_store %arg7[%c0_19, %c0_20], %40 {strides = array<i32>} : memref<64x32xf32, #tpu.memory_space<vmem>>, vector<64x32xf32>,
    %c0_i32_21 = arith.constant 0 : i32
    %42 = arith.cmpi eq, %arg1, %c0_i32_21 : i32
    %43 = arith.extui %42 : i1 to i32
    %c0_i32_22 = arith.constant 0 : i32
    %44 = arith.cmpi ne, %43, %c0_i32_22 : i32
    scf.if %44 {
      %c0_23 = arith.constant 0 : index
      %c0_24 = arith.constant 0 : index
      %45 = vector.load %arg7[%c0_23, %c0_24] : memref<64x32xf32, #tpu.memory_space<vmem>>, vector<64x32xf32>
      %cst_25 = arith.constant dense<0.000000e+00> : vector<32xf32>
      %46 = vector.multi_reduction <add>, %45, %cst_25 [0] : vector<64x32xf32> to vector<32xf32>
      %47 = vector.shape_cast %46 : vector<32xf32> to vector<1x32xf32>
      %cst_26 = arith.constant dense<0.000000e+00> : vector<1xf32>
      %48 = vector.multi_reduction <add>, %47, %cst_26 [1] : vector<1x32xf32> to vector<1xf32>
      %49 = vector.shape_cast %48 : vector<1xf32> to vector<1x1xf32>
      %cst_27 = arith.constant 1.562500e-02 : f32
      %50 = vector.broadcast %cst_27 : f32 to vector<1x1xf32>
      %51 = arith.mulf %49, %50 : vector<1x1xf32>
      %52 = vector.shape_cast %51 : vector<1x1xf32> to vector<1x1x1xf32>
      %53 = vector.shape_cast %52 : vector<1x1x1xf32> to vector<1x1x1xf32>
      %54 = vector.broadcast %53 : vector<1x1x1xf32> to vector<1x8x128xf32>
      %c0_28 = arith.constant 0 : index
      %c0_29 = arith.constant 0 : index
      %c0_30 = arith.constant 0 : index
      %55 = vector.load %arg6[%c0_28, %c0_29, %c0_30] : memref<1x8x128xf32, #tpu.memory_space<vmem>>, vector<1x8x128xf32>
      tpu.vector_store %arg6[%c0_28, %c0_29, %c0_30], %54 {strides = array<i32>} : memref<1x8x128xf32, #tpu.memory_space<vmem>>, vector<1x8x128xf32>,
    } else {
    }
    return
  }
  func.func @transform_0(%arg0: i32, %arg1: i32) -> (i32, i32, i32) {
    %c0_i32 = arith.constant 0 : i32
    %c0_i32_0 = arith.constant 0 : i32
    return %arg0, %arg1, %c0_i32 : i32, i32, i32
  }
  func.func @transform_1(%arg0: i32, %arg1: i32) -> (i32, i32, i32) {
    %c0_i32 = arith.constant 0 : i32
    %c0_i32_0 = arith.constant 0 : i32
    return %arg0, %arg1, %c0_i32 : i32, i32, i32
  }
  func.func @transform_2(%arg0: i32, %arg1: i32) -> (i32, i32) {
    %c0_i32 = arith.constant 0 : i32
    %c0_i32_0 = arith.constant 0 : i32
    %c0_i32_1 = arith.constant 0 : i32
    return %c0_i32, %c0_i32_0 : i32, i32
  }
  func.func @transform_3(%arg0: i32, %arg1: i32) -> (i32, i32) {
    %c0_i32 = arith.constant 0 : i32
    %c0_i32_0 = arith.constant 0 : i32
    %c0_i32_1 = arith.constant 0 : i32
    return %c0_i32, %c0_i32_0 : i32, i32
  }
  func.func @transform_4(%arg0: i32, %arg1: i32) -> (i32, i32, i32) {
    %c0_i32 = arith.constant 0 : i32
    %c0_i32_0 = arith.constant 0 : i32
    %c0_i32_1 = arith.constant 0 : i32
    return %arg0, %c0_i32, %c0_i32_0 : i32, i32, i32
  }
}

</mosaic_0001>

<bundles_post_ra>
// kernel: tpu_custom_call.1
= control target key start
LH: loop header
LB: loop body
LE: loop exit
PB: predicated region body
PF: predicated region fallthrough
CT: control target
= control target key end

     0   :  { %9 = vsyncpa [#allocation4], 0  ;;  %s1669_s0 = inlined_call_operand.vmem [shape: bf16[2,64,32], index: 0, kind: input, shape index: {}]   ;;  %s1670_s1 = inlined_call_operand.vmem [shape: bf16[2,64,32], index: 1, kind: input, shape index: {}]   ;;  %s1671_s2 = inlined_call_operand.vmem [shape: bf16[32,32], index: 2, kind: input, shape index: {}]   ;;  %s1672_s3 = inlined_call_operand.vmem [shape: f32[1,32], index: 3, kind: input, shape index: {}]   ;;  %s1673_s4 = inlined_call_operand.hbm [shape: f32[2,8,128], index: 4, kind: output, shape index: {}]  }
   0x1   :  { %11 = vsyncpa [#allocation4 + $0x1], 0  ;;  %s1242_s15 = smov 0   ;;  %s1244_s16 = smov 0  }
   0x2   :  { %s1246_s17 = smov 0   ;;  %s1248_s18 = smov 0  }
   0x3   :  { %s1250_s19 = smov 0   ;;  %s1252_s20 = smov 0  }
   0x4 LB: > { %s937_s21 = sadd.s32 4294967295, %s1214_s20   ;;  %s938_s22 = sadd.s32 4294967294, %s1214_s20   ;;  %s1214_s20 = sphi %s1252_s20, %s17_s20   ;;  %s1210_s19 = sphi %s1250_s19, %s1680_s19   ;;  %s1206_s18 = sphi %s1248_s18, %s1679_s18   ;;  %s1202_s17 = sphi %s1246_s17, %s1678_s17   ;;  %s1198_s16 = sphi %s1244_s16, %s1677_s16   ;;  %s1194_s15 = sphi %s1242_s15, %s1676_s15  }
   0x5   : > { %s29_s23 = sadd.s32 1, %s1210_s19  ;;  %s134_s24 = sadd.s32 1, %s1202_s17 }
   0x6   : > { %p31_p0 = scmp.ge.s32.totalorder %s29_s23, 2  ;;  %p144_p1 = scmp.ne.s32.totalorder %s1202_s17, %s1198_s16 }
   0x7   : > { %p145_p2 = scmp.eq.s32.totalorder %s937_s21, 1  ;;  %p150_p3 = scmp.ne.s32.totalorder %s1198_s16, %s1194_s15 }
   0x8   : > { %s1682_s23 = smov (%p31_p0, %s29_s23), 0  ;;  %p151_p5 = scmp.eq.s32.totalorder %s938_s22, 1 }
   0x9   : > { %p1282_p4 = por %p145_p2, %p144_p1  ;;  %s131_s26 = ssub.s32 %s1210_s19, %s1682_s23 }
   0xa   : > { %p941_p6 = scmp.ge.s32.totalorder %s1214_s20, 1  ;;  %p132_p7 = scmp.eq.s32.totalorder %s131_s26, 0 }
   0xb   : > { %p1289_p8 = por %p151_p5, %p150_p3  ;;  %p201_p9 = scmp.lt.s32.totalorder %s1214_s20, 3 }
   0xc   : > { %s1295_s28 = scalar_select %p132_p7, %s1202_s17, %s134_s24  }
   0xd   : > { %p202_p10 = pnand %p941_p6, %p201_p9 }
   0xe   : > { %p241_p11 = scmp.lt.s32.totalorder (!%p202_p10), %s1206_s18, 1  ;;  %s237_s24 = sand.u32 (!%p202_p10), 1, %s1198_s16  }
   0xf   : > { %205 = sbr.rel (%p202_p10) target bundleno = 513 (0x201), region = 36  ;;  %s942_s26 = sshll.u32 (!%p202_p10), %s237_s24, 3 }
  0x10   : > { %s996_s29 = sshll.u32 (!%p202_p10), %s1206_s18, 3  ;;  %s831_s10 = scalar_lea.sflag (!%p202_p10), [#allocation4], %s237_s24 }
  0x11   : > { %s841_s6 = scalar_lea.hbm (!%p202_p10), %s1673_s4, %s996_s29 }
  0x12   : > { %s845_s9 = sshll.u32 (!%p202_p10), %s841_s6, 4  ;;  %s846_s9 = int_to_ptr.hbm [resolvable:$true] %s845_s9 }
  0x14   : > { %v1002_v0 = vld [vmem:[%s1671_s2 + $0x8] sm:$0xff]  ;;  %v1001_v1 = vld [vmem:[%s1671_s2] sm:$0xff]  ;;  %s242_s7 = scalar_select %p241_p11, %s1206_s18, 1  ;;  %vm265_vm0 = vcmask 261120  }
  0x15   : > { %349 = vmatpush.bf16.msra.mxu0 %v1002_v0  ;;  %1011 = vmatpush.bf16.msra.mxu2 %v1002_v0  ;;  %v1322_v10 = vld [vmem:[%s1672_s3] ss:$0 sm:$0xff] }
  0x16   : > { %418 = vmatpush.bf16.msra.mxu1 %v1002_v0  ;;  %1013 = vmatpush.bf16.msra.mxu3 %v1002_v0  ;;  %s999_s8 = sshll.u32 %s242_s7, 5  ;;  %s239_s7 = scalar_lea.vmem [#allocation3], %s942_s26 }
  0x17   : > { %s248_s11 = scalar_lea.vmem %s1669_s0, %s999_s8  ;;  %s258_s14 = scalar_lea.vmem %s1670_s1, %s999_s8 }
  0x18   : > { %v1003_v2 = vld [vmem:[%s248_s11] sm:$0xff]  ;;  %v1005_v3 = vld [vmem:[%s248_s11 + $0x10] sm:$0xff]  ;;  %v1004_v6 = vld [vmem:[%s248_s11 + $0x8] sm:$0xff]  ;;  %s843_s8 = sshll.u32 %s239_s7, 4  ;;  %s844_s8 = int_to_ptr.vmem [resolvable:$true] %s843_s8 }
  0x19   : > { %350 = vmatpush.bf16.msra.mxu0 %v1001_v1  ;;  %1012 = vmatpush.bf16.msra.mxu2 %v1001_v1  ;;  %v1007_v4 = vld [vmem:[%s258_s14] sm:$0xff]  ;;  %v1009_v5 = vld [vmem:[%s258_s14 + $0x10] sm:$0xff]  ;;  %v1006_v7 = vld [vmem:[%s248_s11 + $0x18] sm:$0xff]  ;;  %s1150_s11 = sshra.s32 %s846_s9, 4  ;;  %s1151_s11 = int_to_ptr.hbm [resolvable:$true] %s1150_s11 }
  0x1a   : > { %419 = vmatpush.bf16.msra.mxu1 %v1001_v1  ;;  %1014 = vmatpush.bf16.msra.mxu3 %v1001_v1  ;;  %v1008_v8 = vld [vmem:[%s258_s14 + $0x8] sm:$0xff]  ;;  %v1010_v9 = vld [vmem:[%s258_s14 + $0x18] sm:$0xff]  ;;  %s1152_s12 = scalar_lea.hbm %s1151_s11, 8  ;;  %s1156_s14 = scalar_lea.hbm %s1673_s4, 16 }
  0x1b   : > { %p1153_p12 = scmp.ne.s32.totalorder %s1151_s11, %s1152_s12  ;;  %p1157_p1 = scmp.lt.s32.totalorder %s1151_s11, %s1673_s4 }
  0x1c   : > { %971 = vmatmul.msk.bf16.vlgmr.msra.gmra.mxu0 %vm265_vm0, %v1003_v2  ;;  %973 = vmatmul.msk.bf16.vlgmr.msra.gmra.mxu2 %vm265_vm0, %v1005_v3  ;;  %p1158_p2 = scmp.lt.s32.totalorder %s1156_s14, %s1152_s12 }
  0x1d   : > { %991 = vmatmul.msk.bf16.vlgmr.msra.gmra.mxu1 %vm265_vm0, %v1007_v4  ;;  %993 = vmatmul.msk.bf16.vlgmr.msra.gmra.mxu3 %vm265_vm0, %v1009_v5  ;;  %p1154_p13 = pnand %p1153_p12, %p1282_p4 }
  0x1e   : > { %p1159_p3 = por %p1158_p2, %p1157_p1 }
  0x1f   : > { %p1155_p0 = pneg %p1154_p13 }
  0x21   : > { %p1160_p5 = pnand %p1159_p3, %p1155_p0 }
  0x2c   : > { %972 = vmatmul.msk.bf16.gmra.mxu0 %vm265_vm0, %v1004_v6  ;;  %974 = vmatmul.msk.bf16.gmra.mxu2 %vm265_vm0, %v1006_v7 }
  0x2d   : > { %992 = vmatmul.msk.bf16.gmra.mxu1 %vm265_vm0, %v1008_v8  ;;  %994 = vmatmul.msk.bf16.gmra.mxu3 %vm265_vm0, %v1010_v9 }
  0x99   : > { %v352_v11 = vpop.f32.mrf.mxu0 }
  0x9a   : > { %v353_v12 = vadd.f32 %v1322_v10, %v352_v11  ;;  %v421_v13 = vpop.f32.mrf.mxu1 }
  0x9b   : > { %v422_v14 = vadd.f32 %v1322_v10, %v421_v13 }
  0x9c   : > { %v1326_v15 = vmax.f32 %v353_v12, 0.0 }
  0x9d   : > { %v1328_v16 = vmax.f32 %v422_v14, 0.0 }
  0x9e   : > { %v449_v17 = vmul.f32 %v1326_v15, %v1326_v15 }
  0x9f   : > { %v362_v18 = vpop.f32.mrf.mxu2  ;;  %v593_v19 = vmul.f32 %v1328_v16, %v1328_v16 }
  0xa0   : > { %v363_v20 = vadd.f32 %v1322_v10, %v362_v18  ;;  %v431_v21 = vpop.f32.mrf.mxu3  ;;  %v457_v22 = vsel %vm265_vm0, %v449_v17, 0.0 }
  0xa1   : > { %v432_v23 = vadd.f32 %v1322_v10, %v431_v21  ;;  %v601_v24 = vsel %vm265_vm0, %v593_v19, 0.0  ;;  %v354_v25 = vpop.f32.mrf.mxu0  ;;  %458 = vadd.xlane.f32.xlu0 %v457_v22 }
  0xa2   : > { %v1338_v26 = vmax.f32 %v363_v20, 0.0  ;;  %v423_v27 = vpop.f32.mrf.mxu1  ;;  %602 = vadd.xlane.f32.xlu1 %v601_v24  ;;  %v355_v30 = vadd.f32 %v1322_v10, %v354_v25 }
  0xa3   : > { %v1340_v28 = vmax.f32 %v432_v23, 0.0  ;;  %v424_v29 = vadd.f32 %v1322_v10, %v423_v27 }
  0xa4   : > { %v453_v31 = vmul.f32 %v1338_v26, %v1338_v26  ;;  %v1354_v38 = vmax.f32 %v355_v30, 0.0 }
  0xa5   : > { %v1346_v32 = vmax.f32 %v424_v29, 0.0  ;;  %v597_v33 = vmul.f32 %v1340_v28, %v1340_v28 }
  0xa6   : > { %v469_v34 = vsel %vm265_vm0, %v453_v31, 0.0  ;;  %v450_v48 = vmul.f32 %v1354_v38, %v1354_v38  ;;  %v1216_v31 = vmov 0.0  }
  0xa7   : > { %v364_v35 = vpop.f32.mrf.mxu2  ;;  %470 = vadd.xlane.f32.xlu2 %v469_v34  ;;  %v594_v36 = vmul.f32 %v1346_v32, %v1346_v32  ;;  %v613_v37 = vsel %vm265_vm0, %v597_v33, 0.0  ;;  %266 = vst.msk [vmem:[#allocation2] sm:$0xff] %vm265_vm0, %v1216_v31 }
  0xa8   : > { %v365_v39 = vadd.f32 %v1322_v10, %v364_v35  ;;  %v433_v40 = vpop.f32.mrf.mxu3  ;;  %v460_v56 = vsel %vm265_vm0, %v450_v48, 0.0  ;;  %267 = vst.msk [vmem:[#allocation2 + $0x8] sm:$0xff] %vm265_vm0, %v1216_v31 }
  0xa9   : > { %v604_v41 = vsel %vm265_vm0, %v594_v36, 0.0  ;;  %v357_v42 = vpop.f32.mrf.mxu0  ;;  %614 = vadd.xlane.f32.xlu0 %v613_v37  ;;  %v434_v63 = vadd.f32 %v1322_v10, %v433_v40  ;;  %268 = vst.msk [vmem:[#allocation2 + $0x10] sm:$0xff] %vm265_vm0, %v1216_v31 }
  0xaa   : > { %v1358_v43 = vmax.f32 %v365_v39, 0.0  ;;  %v426_v44 = vpop.f32.mrf.mxu1  ;;  %605 = vadd.xlane.f32.xlu1 %v604_v41  ;;  %v358_v45 = vadd.f32 %v1322_v10, %v357_v42  ;;  %269 = vst.msk [vmem:[#allocation2 + $0x18] sm:$0xff] %vm265_vm0, %v1216_v31 }
  0xab   : > { %v427_v46 = vadd.f32 %v1322_v10, %v426_v44  ;;  %v1393_v7 = vmax.f32 %v434_v63, 0.0  ;;  %270 = vst.msk [vmem:[#allocation2 + $0x20] sm:$0xff] %vm265_vm0, %v1216_v31 }
  0xac   : > { %v1362_v47 = vmax.f32 %v358_v45, 0.0  ;;  %v454_v49 = vmul.f32 %v1358_v43, %v1358_v43  ;;  %271 = vst.msk [vmem:[#allocation2 + $0x28] sm:$0xff] %vm265_vm0, %v1216_v31 }
  0xad   : > { %v1370_v52 = vmax.f32 %v427_v46, 0.0  ;;  %v598_v19 = vmul.f32 %v1393_v7, %v1393_v7  ;;  %272 = vst.msk [vmem:[#allocation2 + $0x30] sm:$0xff] %vm265_vm0, %v1216_v31 }
  0xae   : > { %v451_v50 = vmul.f32 %v1362_v47, %v1362_v47  ;;  %v472_v57 = vsel %vm265_vm0, %v454_v49, 0.0  ;;  %273 = vst.msk [vmem:[#allocation2 + $0x38] sm:$0xff] %vm265_vm0, %v1216_v31 }
  0xaf   : > { %v367_v51 = vpop.f32.mrf.mxu2  ;;  %v595_v1 = vmul.f32 %v1370_v52, %v1370_v52  ;;  %v616_v24 = vsel %vm265_vm0, %v598_v19, 0.0 }
  0xb0   : > { %v368_v53 = vadd.f32 %v1322_v10, %v367_v51  ;;  %v436_v54 = vpop.f32.mrf.mxu3  ;;  %v463_v55 = vsel %vm265_vm0, %v451_v50, 0.0 }
  0xb1   : > { %v359_v58 = vpop.f32.mrf.mxu0  ;;  %464 = vadd.xlane.f32.xlu2 %v463_v55  ;;  %461 = vadd.xlane.f32.xlu0 %v460_v56  ;;  %v437_v62 = vadd.f32 %v1322_v10, %v436_v54  ;;  %v607_v9 = vsel %vm265_vm0, %v595_v1, 0.0 }
  0xb2   : > { %v1376_v59 = vmax.f32 %v368_v53, 0.0  ;;  %v428_v60 = vpop.f32.mrf.mxu1  ;;  %473 = vadd.xlane.f32.xlu1 %v472_v57  ;;  %v360_v0 = vadd.f32 %v1322_v10, %v359_v58 }
  0xb3   : > { %v429_v61 = vadd.f32 %v1322_v10, %v428_v60  ;;  %v1389_v5 = vmax.f32 %v437_v62, 0.0 }
  0xb4   : > { %v455_v2 = vmul.f32 %v1376_v59, %v1376_v59  ;;  %v1395_v8 = vmax.f32 %v360_v0, 0.0 }
  0xb5   : > { %v1386_v3 = vmax.f32 %v429_v61, 0.0  ;;  %v599_v14 = vmul.f32 %v1389_v5, %v1389_v5 }
  0xb6   : > { %v475_v4 = vsel %vm265_vm0, %v455_v2, 0.0  ;;  %v452_v20 = vmul.f32 %v1395_v8, %v1395_v8 }
  0xb7   : > { %v596_v6 = vmul.f32 %v1386_v3, %v1386_v3  ;;  %v369_v11 = vpop.f32.mrf.mxu2  ;;  %v619_v21 = vsel %vm265_vm0, %v599_v14, 0.0 }
  0xb8   : > { %v438_v12 = vpop.f32.mrf.mxu3  ;;  %v370_v17 = vadd.f32 %v1322_v10, %v369_v11  ;;  %v466_v25 = vsel %vm265_vm0, %v452_v20, 0.0 }
  0xb9   : > { %v610_v13 = vsel %vm265_vm0, %v596_v6, 0.0  ;;  %608 = vadd.xlane.f32.xlu2 %v607_v9  ;;  %476 = vadd.xlane.f32.xlu0 %v475_v4  ;;  %v439_v18 = vadd.f32 %v1322_v10, %v438_v12 }
  0xba   : > { %611 = vadd.xlane.f32.xlu1 %v610_v13  ;;  %v1408_v22 = vmax.f32 %v370_v17, 0.0 }
  0xbb   : > { %v1410_v23 = vmax.f32 %v439_v18, 0.0 }
  0xbc   : > { %v456_v10 = vmul.f32 %v1408_v22, %v1408_v22 }
  0xbd   : > { %v600_v27 = vmul.f32 %v1410_v23, %v1410_v23 }
  0xbe   : > { %v478_v29 = vsel %vm265_vm0, %v456_v10, 0.0 }
  0xbf   : > { %v622_v30 = vsel %vm265_vm0, %v600_v27, 0.0 }
  0xc1   : > { %617 = vadd.xlane.f32.xlu2 %v616_v24  ;;  %467 = vadd.xlane.f32.xlu0 %v466_v25 }
  0xc2   : > { %620 = vadd.xlane.f32.xlu1 %v619_v21 }
  0xc9   : > { %479 = vadd.xlane.f32.xlu2 %v478_v29  ;;  %623 = vadd.xlane.f32.xlu0 %v622_v30 }
 0x114   : > { %v459_v33 = vpop.xlane.xlu0 %458 }
 0x115   : > { %v603_v34 = vpop.xlane.xlu1 %602  ;;  %1072 = vrsqrt.f32 %v459_v33  ;;  %vm488_vm1 = vcmp.eq.f32.partialorder %v459_v33, inf  ;;  %vm490_vm2 = vcmp.eq.f32.partialorder %v459_v33, 0.0  ;;  %v491_v57 = vand.u32 2147483648, %v459_v33 }
 0x116   : > { %1074 = vrsqrt.f32 %v603_v34  ;;  %vm632_vm3 = vcmp.eq.f32.partialorder %v603_v34, inf  ;;  %vm634_vm4 = vcmp.eq.f32.partialorder %v603_v34, 0.0  ;;  %v635_v9 = vand.u32 2147483648, %v603_v34 }
 0x11a   : > { %v1428_v35 = vpop.xlane.xlu2 %470 }
 0x11b   : > { %v1073_v36 = vpop.eup %1072  ;;  %1076 = vrsqrt.f32 %v1428_v35  ;;  %vm536_vm5 = vcmp.eq.f32.partialorder %v1428_v35, inf  ;;  %vm538_vm6 = vcmp.eq.f32.partialorder %v1428_v35, 0.0  ;;  %v539_v30 = vand.u32 2147483648, %v1428_v35 }
 0x11c   : > { %v1075_v37 = vpop.eup %1074  ;;  %v482_v39 = vmul.f32 %v1073_v36, %v459_v33  ;;  %v1431_v40 = vpop.xlane.xlu0 %614 }
 0x11d   : > { %v626_v41 = vmul.f32 %v1075_v37, %v603_v34  ;;  %v1433_v42 = vpop.xlane.xlu1 %605  ;;  %1078 = vrsqrt.f32 %v1431_v40  ;;  %vm680_vm7 = vcmp.eq.f32.partialorder %v1431_v40, inf  ;;  %vm682_vm8 = vcmp.eq.f32.partialorder %v1431_v40, 0.0 }
 0x11e   : > { %v483_v44 = vmul.f32 %v1073_v36, %v482_v39  ;;  %1080 = vrsqrt.f32 %v1433_v42  ;;  %vm644_vm9 = vcmp.eq.f32.partialorder %v1433_v42, inf  ;;  %vm646_vm10 = vcmp.eq.f32.partialorder %v1433_v42, 0.0 }
 0x11f   : > { %v627_v45 = vmul.f32 %v1075_v37, %v626_v41 }
 0x120   : > { %v484_v46 = vmul.f32 0.5, %v483_v44 }
 0x121   : > { %v1077_v48 = vpop.eup %1076  ;;  %v628_v49 = vmul.f32 0.5, %v627_v45 }
 0x122   : > { %v485_v50 = vsub.f32 1.5, %v484_v46  ;;  %v530_v51 = vmul.f32 %v1077_v48, %v1428_v35 }
 0x123   : > { %v1079_v53 = vpop.eup %1078  ;;  %v629_v54 = vsub.f32 1.5, %v628_v49 }
 0x124   : > { %v1081_v55 = vpop.eup %1080  ;;  %v486_v56 = vmul.f32 %v1073_v36, %v485_v50  ;;  %v531_v58 = vmul.f32 %v1077_v48, %v530_v51  ;;  %v674_v60 = vmul.f32 %v1079_v53, %v1431_v40  ;;  %v1439_v61 = vpop.xlane.xlu2 %464  ;;  %v683_v51 = vand.u32 2147483648, %v1431_v40 }
 0x125   : > { %v630_v62 = vmul.f32 %v1075_v37, %v629_v54  ;;  %v638_v63 = vmul.f32 %v1081_v55, %v1433_v42  ;;  %v1442_v0 = vpop.xlane.xlu1 %473  ;;  %1082 = vrsqrt.f32 %v1439_v61  ;;  %v1448_v17 = vpop.xlane.xlu0 %461  ;;  %vm512_vm11 = vcmp.eq.f32.partialorder %v1439_v61, inf }
 0x126   : > { %v487_v1 = vmul.f32 %v486_v56, %v459_v33  ;;  %v532_v2 = vmul.f32 0.5, %v531_v58  ;;  %v675_v4 = vmul.f32 %v1079_v53, %v674_v60  ;;  %1084 = vrsqrt.f32 %v1442_v0 }
 0x127   : > { %v631_v6 = vmul.f32 %v630_v62, %v603_v34  ;;  %v639_v11 = vmul.f32 %v1081_v55, %v638_v63  ;;  %1086 = vrsqrt.f32 %v1448_v17  ;;  %vm548_vm12 = vcmp.eq.f32.partialorder %v1442_v0, inf }
 0x128   : > { %v489_v12 = vsel %vm488_vm1, %v459_v33, %v487_v1  ;;  %v533_v13 = vsub.f32 1.5, %v532_v2  ;;  %v676_v14 = vmul.f32 0.5, %v675_v4  ;;  %vm550_vm13 = vcmp.eq.f32.partialorder %v1442_v0, 0.0 }
 0x129   : > { %v633_v18 = vsel %vm632_vm3, %v603_v34, %v631_v6  ;;  %v492_v19 = vsel %vm490_vm2, %v491_v57, %v489_v12  ;;  %v640_v20 = vmul.f32 0.5, %v639_v11  ;;  %vm514_vm14 = vcmp.eq.f32.partialorder %v1439_v61, 0.0 }
 0x12a   : > { %v636_v21 = vsel %vm634_vm4, %v635_v9, %v633_v18  ;;  %v577_v24 = vadd.f32 1e-10, %v492_v19  ;;  %v534_v25 = vmul.f32 %v1077_v48, %v533_v13  ;;  %v677_v10 = vsub.f32 1.5, %v676_v14 }
 0x12b   : > { %v1083_v27 = vpop.eup %1082  ;;  %v721_v29 = vadd.f32 1e-10, %v636_v21  ;;  %v641_v31 = vsub.f32 1.5, %v640_v20  ;;  %vm500_vm15 = vcmp.eq.f32.partialorder %v1448_v17, inf  ;;  %vm502_vm1 = vcmp.eq.f32.partialorder %v1448_v17, 0.0 }
 0x12c   : > { %v1085_v36 = vpop.eup %1084  ;;  %1088 = vrcp.f32 %v577_v24  ;;  %v535_v34 = vmul.f32 %v534_v25, %v1428_v35  ;;  %v678_v33 = vmul.f32 %v1079_v53, %v677_v10  ;;  %v506_v37 = vmul.f32 %v1083_v27, %v1439_v61  ;;  %v1472_v57 = vpop.xlane.xlu2 %608 }
 0x12d   : > { %1090 = vrcp.f32 %v721_v29  ;;  %v642_v39 = vmul.f32 %v1081_v55, %v641_v31  ;;  %v542_v41 = vmul.f32 %v1085_v36, %v1442_v0  ;;  %v1459_v44 = vpop.xlane.xlu1 %611  ;;  %v1087_v58 = vpop.eup %1086  ;;  %vm656_vm2 = vcmp.eq.f32.partialorder %v1472_v57, inf }
 0x12e   : > { %v537_v45 = vsel %vm536_vm5, %v1428_v35, %v535_v34  ;;  %v679_v46 = vmul.f32 %v678_v33, %v1431_v40  ;;  %v507_v48 = vmul.f32 %v1083_v27, %v506_v37  ;;  %1092 = vrsqrt.f32 %v1459_v44  ;;  %v1479_v12 = vpop.xlane.xlu0 %476 }
 0x12f   : > { %v540_v49 = vsel %vm538_vm6, %v539_v30, %v537_v45  ;;  %v643_v50 = vmul.f32 %v642_v39, %v1433_v42  ;;  %v543_v53 = vmul.f32 %v1085_v36, %v542_v41  ;;  %v494_v11 = vmul.f32 %v1087_v58, %v1448_v17 }
 0x130   : > { %v581_v54 = vadd.f32 1e-10, %v540_v49  ;;  %v681_v55 = vsel %vm680_vm7, %v1431_v40, %v679_v46  ;;  %v508_v56 = vmul.f32 0.5, %v507_v48  ;;  %v647_v40 = vand.u32 2147483648, %v1433_v42 }
 0x131   : > { %v684_v60 = vsel %vm682_vm8, %v683_v51, %v681_v55  ;;  %v544_v62 = vmul.f32 0.5, %v543_v53  ;;  %v645_v63 = vsel %vm644_vm9, %v1433_v42, %v643_v50  ;;  %v495_v20 = vmul.f32 %v1087_v58, %v494_v11 }
 0x132   : > { %v1089_v35 = vpop.eup %1088  ;;  %1094 = vrcp.f32 %v581_v54  ;;  %v725_v1 = vadd.f32 1e-10, %v684_v60  ;;  %v509_v2 = vsub.f32 1.5, %v508_v56  ;;  %v648_v18 = vsel %vm646_vm10, %v647_v40, %v645_v63 }
 0x133   : > { %v1091_v4 = vpop.eup %1090  ;;  %v737_v6 = vmul.f32 %v1089_v35, %v1326_v15  ;;  %v545_v9 = vsub.f32 1.5, %v544_v62  ;;  %v761_v15 = vld [vmem:[#allocation2] sm:$0xff]  ;;  %v496_v10 = vmul.f32 0.5, %v495_v20  ;;  %v722_v42 = vadd.f32 1e-10, %v648_v18 }
 0x134   : > { %v745_v13 = vmul.f32 %v1091_v4, %v1328_v16  ;;  %1096 = vrcp.f32 %v725_v1  ;;  %v510_v14 = vmul.f32 %v1083_v27, %v509_v2  ;;  %v1483_v21 = vpop.eup %1092  ;;  %v551_v33 = vand.u32 2147483648, %v1442_v0  ;;  %v1497_v39 = vpop.xlane.xlu2 %617 }
 0x135   : > { %v546_v19 = vmul.f32 %v1085_v36, %v545_v9  ;;  %1098 = vrsqrt.f32 %v1472_v57  ;;  %v662_v29 = vmul.f32 %v1483_v21, %v1459_v44  ;;  %v497_v31 = vsub.f32 1.5, %v496_v10  ;;  %v1502_v49 = vpop.xlane.xlu1 %620 }
 0x136   : > { %v753_v24 = vsub.f32 %v737_v6, %v745_v13  ;;  %v511_v25 = vmul.f32 %v510_v14, %v1439_v61  ;;  %1100 = vrsqrt.f32 %v1479_v12  ;;  %v515_v51 = vand.u32 2147483648, %v1439_v61  ;;  %v1513_v55 = vpop.xlane.xlu0 %467 }
 0x137   : > { %v547_v27 = vmul.f32 %v546_v19, %v1442_v0  ;;  %v663_v37 = vmul.f32 %v1483_v21, %v662_v29  ;;  %v498_v48 = vmul.f32 %v1087_v58, %v497_v31  ;;  %1102 = vrcp.f32 %v722_v42  ;;  %v765_v58 = vld [vmem:[#allocation2 + $0x20] sm:$0xff] }
 0x138   : > { %v1095_v16 = vpop.eup %1094  ;;  %v769_v30 = vmul.f32 %v753_v24, %v753_v24  ;;  %v513_v46 = vsel %vm512_vm11, %v1439_v61, %v511_v25  ;;  %v503_v62 = vand.u32 2147483648, %v1448_v17  ;;  %1104 = vrsqrt.f32 %v1502_v49 }
 0x139   : > { %v741_v41 = vmul.f32 %v1095_v16, %v1338_v26  ;;  %v549_v26 = vsel %vm548_vm12, %v1442_v0, %v547_v27  ;;  %v516_v60 = vsel %vm514_vm14, %v515_v51, %v513_v46  ;;  %v664_v35 = vmul.f32 0.5, %v663_v37 }
 0x13a   : > { %v1097_v36 = vpop.eup %1096  ;;  %v777_v34 = vadd.f32 %v769_v30, %v761_v15  ;;  %v552_v6 = vsel %vm550_vm13, %v551_v33, %v549_v26  ;;  %v579_v18 = vadd.f32 1e-10, %v516_v60  ;;  %1106 = vrsqrt.f32 %v1497_v39 }
 0x13b   : > { %v749_v45 = vmul.f32 %v1097_v36, %v1340_v28  ;;  %v1099_v50 = vpop.eup %1098  ;;  %v499_v28 = vmul.f32 %v498_v48, %v1448_v17  ;;  %v665_v19 = vsub.f32 1.5, %v664_v35  ;;  %v671_v20 = vand.u32 2147483648, %v1459_v44 }
 0x13c   : > { %785 = vst.msk [vmem:[#allocation2] sm:$0xff] %vm265_vm0, %v777_v34  ;;  %v650_v54 = vmul.f32 %v1099_v50, %v1472_v57  ;;  %v1101_v56 = vpop.eup %1100  ;;  %v582_v25 = vadd.f32 1e-10, %v552_v6  ;;  %vm658_vm3 = vcmp.eq.f32.partialorder %v1472_v57, 0.0  ;;  %vm668_vm4 = vcmp.eq.f32.partialorder %v1459_v44, inf }
 0x13d   : > { %v757_v53 = vsub.f32 %v741_v41, %v749_v45  ;;  %v501_v1 = vsel %vm500_vm15, %v1448_v17, %v499_v28  ;;  %v554_v4 = vmul.f32 %v1101_v56, %v1479_v12  ;;  %v1103_v14 = vpop.eup %1102  ;;  %v1531_v17 = vpop.xlane.xlu2 %479  ;;  %v659_v29 = vand.u32 2147483648, %v1472_v57 }
 0x13e   : > { %v651_v2 = vmul.f32 %v1099_v50, %v650_v54  ;;  %v504_v40 = vsel %vm502_vm1, %v503_v62, %v501_v1  ;;  %v1105_v15 = vpop.eup %1104  ;;  %v746_v42 = vmul.f32 %v1103_v14, %v1346_v32  ;;  %v666_v27 = vmul.f32 %v1483_v21, %v665_v19  ;;  %v1541_v33 = vpop.xlane.xlu0 %623  ;;  %v762_v1 = vld [vmem:[#allocation2 + $0x8] sm:$0xff] }
 0x13f   : > { %v773_v63 = vmul.f32 %v757_v53, %v757_v53  ;;  %v578_v61 = vadd.f32 1e-10, %v504_v40  ;;  %v555_v13 = vmul.f32 %v1101_v56, %v554_v4  ;;  %v698_v30 = vmul.f32 %v1105_v15, %v1502_v49 }
 0x140   : > { %v652_v11 = vmul.f32 0.5, %v651_v2  ;;  %vm560_vm5 = vcmp.eq.f32.partialorder %v1479_v12, inf  ;;  %v1107_v37 = vpop.eup %1106  ;;  %vm670_vm6 = vcmp.eq.f32.partialorder %v1459_v44, 0.0  ;;  %vm562_vm7 = vcmp.eq.f32.partialorder %v1479_v12, 0.0 }
 0x141   : > { %v781_v9 = vadd.f32 %v773_v63, %v765_v58  ;;  %1108 = vrcp.f32 %v578_v61  ;;  %v556_v0 = vmul.f32 0.5, %v555_v13  ;;  %v699_v34 = vmul.f32 %v1105_v15, %v698_v30 }
 0x142   : > { %v653_v24 = vsub.f32 1.5, %v652_v11  ;;  %1110 = vrsqrt.f32 %v1513_v55  ;;  %v563_v32 = vand.u32 2147483648, %v1479_v12  ;;  %vm704_vm8 = vcmp.eq.f32.partialorder %v1502_v49, inf }
 0x143   : > { %789 = vst.msk [vmem:[#allocation2 + $0x20] sm:$0xff] %vm265_vm0, %v781_v9  ;;  %v557_v16 = vsub.f32 1.5, %v556_v0  ;;  %1112 = vrcp.f32 %v579_v18  ;;  %v700_v46 = vmul.f32 0.5, %v699_v34  ;;  %vm706_vm9 = vcmp.eq.f32.partialorder %v1502_v49, 0.0 }
 0x144   : > { %v654_v10 = vmul.f32 %v1099_v50, %v653_v24  ;;  %1114 = vrsqrt.f32 %v1531_v17  ;;  %v686_v48 = vmul.f32 %v1107_v37, %v1497_v39  ;;  %v667_v53 = vmul.f32 %v666_v27, %v1459_v44 }
 0x145   : > { %v558_v36 = vmul.f32 %v1101_v56, %v557_v16  ;;  %1116 = vrcp.f32 %v582_v25  ;;  %v701_v56 = vsub.f32 1.5, %v700_v46  ;;  %vm692_vm10 = vcmp.eq.f32.partialorder %v1497_v39, inf }
 0x146   : > { %v655_v31 = vmul.f32 %v654_v10, %v1472_v57  ;;  %1118 = vrsqrt.f32 %v1541_v33  ;;  %v687_v58 = vmul.f32 %v1107_v37, %v686_v48  ;;  %v669_v9 = vsel %vm668_vm4, %v1459_v44, %v667_v53 }
 0x147   : > { %v1109_v21 = vpop.eup %1108  ;;  %v559_v45 = vmul.f32 %v558_v36, %v1479_v12  ;;  %v702_v2 = vmul.f32 %v1105_v15, %v701_v56  ;;  %vm694_vm11 = vcmp.eq.f32.partialorder %v1497_v39, 0.0  ;;  %v672_v25 = vsel %vm670_vm6, %v671_v20, %v669_v9 }
 0x148   : > { %v657_v41 = vsel %vm656_vm2, %v1472_v57, %v655_v31  ;;  %v1111_v50 = vpop.eup %1110  ;;  %v738_v51 = vmul.f32 %v1109_v21, %v1354_v38  ;;  %v707_v38 = vand.u32 2147483648, %v1502_v49  ;;  %v688_v4 = vmul.f32 0.5, %v687_v58 }
 0x149   : > { %v660_v26 = vsel %vm658_vm3, %v659_v29, %v657_v41  ;;  %v561_v54 = vsel %vm560_vm5, %v1479_v12, %v559_v45  ;;  %v1113_v60 = vpop.eup %1112  ;;  %v518_v63 = vmul.f32 %v1111_v50, %v1513_v55  ;;  %v703_v13 = vmul.f32 %v702_v2, %v1502_v49 }
 0x14a   : > { %v723_v28 = vadd.f32 1e-10, %v660_v26  ;;  %v754_v62 = vsub.f32 %v738_v51, %v746_v42  ;;  %v564_v35 = vsel %vm562_vm7, %v563_v32, %v561_v54  ;;  %v1115_v57 = vpop.eup %1114  ;;  %v689_v14 = vsub.f32 1.5, %v688_v4  ;;  %v763_v51 = vld [vmem:[#allocation2 + $0x10] sm:$0xff] }
 0x14b   : > { %v1566_v6 = vpop.eup %1116  ;;  %v519_v12 = vmul.f32 %v1111_v50, %v518_v63  ;;  %v566_v61 = vmul.f32 %v1115_v57, %v1531_v17  ;;  %v583_v11 = vadd.f32 1e-10, %v564_v35  ;;  %v739_v19 = vmul.f32 %v1113_v60, %v1362_v47 }
 0x14c   : > { %1120 = vrcp.f32 %v723_v28  ;;  %v770_v40 = vmul.f32 %v754_v62, %v754_v62  ;;  %v1119_v18 = vpop.eup %1118  ;;  %v705_v10 = vsel %vm704_vm8, %v1502_v49, %v703_v13  ;;  %v690_v29 = vmul.f32 %v1107_v37, %v689_v14  ;;  %v767_v14 = vld [vmem:[#allocation2 + $0x30] sm:$0xff] }
 0x14d   : > { %v520_v0 = vmul.f32 0.5, %v519_v12  ;;  %v567_v15 = vmul.f32 %v1115_v57, %v566_v61  ;;  %v710_v16 = vmul.f32 %v1119_v18, %v1541_v33  ;;  %v708_v47 = vsel %vm706_vm9, %v707_v38, %v705_v10 }
 0x14e   : > { %v778_v24 = vadd.f32 %v770_v40, %v762_v1  ;;  %v695_v30 = vand.u32 2147483648, %v1497_v39  ;;  %1122 = vrcp.f32 %v583_v11  ;;  %v727_v44 = vadd.f32 1e-10, %v708_v47 }
 0x14f   : > { %v521_v42 = vsub.f32 1.5, %v520_v0  ;;  %v568_v27 = vmul.f32 0.5, %v567_v15  ;;  %v691_v20 = vmul.f32 %v690_v29, %v1497_v39  ;;  %v711_v36 = vmul.f32 %v1119_v18, %v710_v16 }
 0x150   : > { %786 = vst.msk [vmem:[#allocation2 + $0x8] sm:$0xff] %vm265_vm0, %v778_v24  ;;  %v724_v34 = vadd.f32 1e-10, %v672_v25  ;;  %1124 = vrcp.f32 %v727_v44  ;;  %vm524_vm12 = vcmp.eq.f32.partialorder %v1513_v55, inf  ;;  %vm526_vm13 = vcmp.eq.f32.partialorder %v1513_v55, 0.0 }
 0x151   : > { %v522_v32 = vmul.f32 %v1111_v50, %v521_v42  ;;  %v569_v21 = vsub.f32 1.5, %v568_v27  ;;  %v693_v49 = vsel %vm692_vm10, %v1497_v39, %v691_v20  ;;  %v712_v41 = vmul.f32 0.5, %v711_v36  ;;  %v764_v42 = vld [vmem:[#allocation2 + $0x18] sm:$0xff]  ;;  %v796_v36 = vld [vmem:[#allocation2] sm:$0xff] }
 0x152   : > { %v1121_v31 = vpop.eup %1120  ;;  %v696_v46 = vsel %vm694_vm11, %v695_v30, %v693_v49  ;;  %v527_v50 = vand.u32 2147483648, %v1513_v55  ;;  %1126 = vrcp.f32 %v724_v34  ;;  %vm572_vm14 = vcmp.eq.f32.partialorder %v1531_v17, inf }
 0x153   : > { %v747_v37 = vmul.f32 %v1121_v31, %v1370_v52  ;;  %v523_v48 = vmul.f32 %v522_v32, %v1513_v55  ;;  %v726_v52 = vadd.f32 1e-10, %v696_v46  ;;  %v570_v53 = vmul.f32 %v1115_v57, %v569_v21 }
 0x154   : > { %v713_v26 = vsub.f32 1.5, %v712_v41  ;;  %v1123_v56 = vpop.eup %1122  ;;  %vm574_vm15 = vcmp.eq.f32.partialorder %v1531_v17, 0.0  ;;  %v575_v38 = vand.u32 2147483648, %v1531_v17  ;;  %vm716_vm1 = vcmp.eq.f32.partialorder %v1541_v33, inf  ;;  %v800_v41 = vld [vmem:[#allocation2 + $0x20] sm:$0xff] }
 0x155   : > { %v755_v45 = vsub.f32 %v739_v19, %v747_v37  ;;  %v525_v54 = vsel %vm524_vm12, %v1513_v55, %v523_v48  ;;  %1128 = vrcp.f32 %v726_v52  ;;  %v571_v58 = vmul.f32 %v570_v53, %v1531_v17 }
 0x156   : > { %v528_v39 = vsel %vm526_vm13, %v527_v50, %v525_v54  ;;  %v714_v60 = vmul.f32 %v1119_v18, %v713_v26  ;;  %v1125_v63 = vpop.eup %1124  ;;  %v719_v55 = vand.u32 2147483648, %v1541_v33  ;;  %v743_v2 = vmul.f32 %v1123_v56, %v1376_v59 }
 0x157   : > { %v771_v28 = vmul.f32 %v755_v45, %v755_v45  ;;  %v580_v35 = vadd.f32 1e-10, %v528_v39  ;;  %v573_v57 = vsel %vm572_vm14, %v1531_v17, %v571_v58  ;;  %v751_v4 = vmul.f32 %v1125_v63, %v1389_v5  ;;  %v797_v44 = vld [vmem:[#allocation2 + $0x8] sm:$0xff] }
 0x158   : > { %v715_v1 = vmul.f32 %v714_v60, %v1541_v33  ;;  %v576_v40 = vsel %vm574_vm15, %v575_v38, %v573_v57  ;;  %vm718_vm2 = vcmp.eq.f32.partialorder %v1541_v33, 0.0  ;;  %v1127_v17 = vpop.eup %1126  ;;  %v742_v19 = vmul.f32 %v1566_v6, %v1358_v43 }
 0x159   : > { %v779_v62 = vadd.f32 %v771_v28, %v763_v51  ;;  %1130 = vrcp.f32 %v580_v35  ;;  %v584_v9 = vadd.f32 1e-10, %v576_v40  ;;  %v759_v61 = vsub.f32 %v743_v2, %v751_v4 }
 0x15a   : > { %v717_v12 = vsel %vm716_vm1, %v1541_v33, %v715_v1  ;;  %v748_v25 = vmul.f32 %v1127_v17, %v1386_v3  ;;  %v766_v33 = vld [vmem:[#allocation2 + $0x28] sm:$0xff]  ;;  %v805_v37 = vsel %vm265_vm0, %v797_v44, 0.0  ;;  %v811_v52 = vsel %vm265_vm0, %v800_v41, 0.0 }
 0x15b   : > { %787 = vst.msk [vmem:[#allocation2 + $0x10] sm:$0xff] %vm265_vm0, %v779_v62  ;;  %v720_v11 = vsel %vm718_vm2, %v719_v55, %v717_v12  ;;  %v1129_v13 = vpop.eup %1128  ;;  %1132 = vrcp.f32 %v584_v9  ;;  %v775_v59 = vmul.f32 %v759_v61, %v759_v61 }
 0x15c   : > { %v728_v18 = vadd.f32 1e-10, %v720_v11  ;;  %v750_v5 = vmul.f32 %v1129_v13, %v1393_v7 }
 0x15d   : > { %v783_v0 = vadd.f32 %v775_v59, %v767_v14 }
 0x15e   : > { %1134 = vrcp.f32 %v728_v18  ;;  %v758_v15 = vsub.f32 %v742_v19, %v750_v5 }
 0x15f   : > { %v1131_v24 = vpop.eup %1130  ;;  %791 = vst.msk [vmem:[#allocation2 + $0x30] sm:$0xff] %vm265_vm0, %v783_v0 }
 0x160   : > { %v740_v10 = vmul.f32 %v1131_v24, %v1395_v8  ;;  %v774_v29 = vmul.f32 %v758_v15, %v758_v15  ;;  %v768_v8 = vld [vmem:[#allocation2 + $0x38] sm:$0xff] }
 0x161   : > { %v1133_v16 = vpop.eup %1132 }
 0x162   : > { %v756_v47 = vsub.f32 %v740_v10, %v748_v25  ;;  %v782_v30 = vadd.f32 %v774_v29, %v766_v33  ;;  %v744_v43 = vmul.f32 %v1133_v16, %v1408_v22  ;;  %v798_v34 = vld [vmem:[#allocation2 + $0x10] sm:$0xff]  ;;  %v804_v22 = vsel %vm265_vm0, %v796_v36, 0.0 }
 0x163   : > { %v807_v21 = vsel %vm265_vm0, %v798_v34, 0.0  ;;  %v806_v49 = vadd.f32 %v805_v37, %v804_v22 }
 0x164   : > { %v1135_v6 = vpop.eup %1134  ;;  %v772_v7 = vmul.f32 %v756_v47, %v756_v47  ;;  %790 = vst.msk [vmem:[#allocation2 + $0x28] sm:$0xff] %vm265_vm0, %v782_v30 }
 0x165   : > { %v752_v27 = vmul.f32 %v1135_v6, %v1410_v23  ;;  %v808_v45 = vadd.f32 %v807_v21, %v806_v49 }
 0x166   : > { %v780_v31 = vadd.f32 %v772_v7, %v764_v42  ;;  %v802_v50 = vld [vmem:[#allocation2 + $0x30] sm:$0xff] }
 0x167   : > { %v760_v3 = vsub.f32 %v744_v43, %v752_v27  ;;  %v815_v56 = vsel %vm265_vm0, %v802_v50, 0.0 }
 0x168   : > { %788 = vst.msk [vmem:[#allocation2 + $0x18] sm:$0xff] %vm265_vm0, %v780_v31 }
 0x169   : > { %v776_v20 = vmul.f32 %v760_v3, %v760_v3 }
 0x16b   : > { %v784_v32 = vadd.f32 %v776_v20, %v768_v8  ;;  %v801_v48 = vld [vmem:[#allocation2 + $0x28] sm:$0xff] }
 0x16c   : > { %v813_v28 = vsel %vm265_vm0, %v801_v48, 0.0 }
 0x16d   : > { %792 = vst.msk [vmem:[#allocation2 + $0x38] sm:$0xff] %vm265_vm0, %v784_v32 }
 0x16f   : > { %v799_v23 = vld [vmem:[#allocation2 + $0x18] sm:$0xff] }
 0x170   : > { %v809_v46 = vsel %vm265_vm0, %v799_v23, 0.0 }
 0x171   : > { %v810_v51 = vadd.f32 %v809_v46, %v808_v45 }
 0x173   : > { %v812_v53 = vadd.f32 %v811_v52, %v810_v51 }
 0x174   : > { %v803_v26 = vld [vmem:[#allocation2 + $0x38] sm:$0xff] }
 0x175   : > { %v814_v54 = vadd.f32 %v813_v28, %v812_v53  ;;  %v817_v39 = vsel %vm265_vm0, %v803_v26, 0.0 }
 0x177   : > { %v816_v58 = vadd.f32 %v815_v56, %v814_v54 }
 0x179   : > { %v818_v60 = vadd.f32 %v817_v39, %v816_v58 }
 0x17b   : > { %v819_v62 = vrot.slane %v818_v60, 4 }
 0x17d   : > { %v820_v35 = vadd.f32 %v819_v62, %v818_v60 }
 0x17f   : > { %v821_v38 = vrot.slane %v820_v35, 2 }
 0x181   : > { %v822_v63 = vadd.f32 %v821_v38, %v820_v35 }
 0x183   : > { %v823_v57 = vrot.slane %v822_v63, 1 }
 0x185   : > { %v824_v1 = vadd.f32 %v823_v57, %v822_v63 }
 0x187   : > { %v825_v55 = vsel %vm265_vm0, %v824_v1, 0.0 }
 0x188   : > { %826 = vadd.xlane.f32.xlu1 %v825_v55 }
 0x1fb   : > { %v827_v2 = vpop.xlane.xlu1 %826 }
 0x1fc   : > { %v828_v4 = vmul.f32 0.015625, %v827_v2 }
 0x1fe   : > { %829 = vst [vmem:[%s239_s7] sm:$0xff] %v828_v4 }
 0x1ff   : > { %1163 = shalt.err (!%p1160_p5)
}
 0x200   : > { %1015 = dma.vmem_to_hbm [thread:$0]  (%p1282_p4), %s844_s8, 128, %s846_s9, %s831_s10  }
 0x201 PF: > { %p1021_p6 = scmp.ge.s32.totalorder %s1214_s20, 2  ;;  %s857_s24 = sand.u32 1, %s1194_s15  }
 0x202   : > { %s858_s26 = scalar_lea.sflag [#allocation4], %s857_s24 }
 0x203   : > { %p1018_p7 = pnand %p1021_p6, %p1289_p8 }
 0x205   : > { %p1019_p9 = pneg %p1018_p7 }
 0x207   : > { %1189 = dma.done.wait (%p1019_p9), %s858_s26, 128  }
 0x208   : > { %1191 = vsyncadd (%p1019_p9), %s858_s26, 4294967168  ;;  %s17_s20 = sadd.s32 1, %s1214_s20   ;;  %s1676_s15 = smov %s1198_s16 }
 0x209   : > { %p14_p10 = scmp.ge.s32.totalorder %s17_s20, 4   ;;  %s1677_s16 = smov %s1202_s17 }
 0x20a   : > { %s1678_s17 = smov %s1295_s28  ;;  %s1679_s18 = smov %s1210_s19 }
 0x20b   : > { %s1680_s19 = smov %s1682_s23  ;;  %16 = sbr.rel (!%p14_p10) target bundleno = 4 (0x4), region = 82 }
 0x210   :  { %864 = vsyncpa [#allocation4], 1 }
 0x211   :  { %866 = vsyncpa [#allocation4 + $0x1], 1 }

</bundles_post_ra>
